<compile_context>
chip_gen: v5e
topology: v5e:2x2
jax: 0.10.0
libtpu: 0.0.40
codegen_flags: <defaults>
</compile_context>

<pallas_src>
import jax
import jax.numpy as jnp
import numpy as np
from jax.experimental import pallas as pl
from jax.experimental.pallas import tpu as pltpu

IN_FEATURES = 12
OUT_FEATURES = 282
# 2 * (12*48 + 48*48 + 48*96 + 96*282) MACs per row
FLOPS_PER_ROW = 2 * (12 * 48 + 48 * 48 + 48 * 96 + 96 * 282)


def mlp_kernel(x_ref, w1_ref, b1_ref, w2_ref, b2_ref,
               w3_ref, b3_ref, w4_ref, b4_ref, o_ref):
    # Matmul operands take the weight dtype (f32 or bf16); accumulation and
    # the bias-add / ReLU / normalize epilogue stay in f32.
    wdt = w1_ref.dtype
    x = x_ref[...].astype(wdt)

    h = jnp.dot(x, w1_ref[...], preferred_element_type=jnp.float32) + b1_ref[...]
    h = jnp.maximum(h, 0.0)

    h = jnp.dot(h.astype(wdt), w2_ref[...],
                preferred_element_type=jnp.float32) + b2_ref[...]
    h = jnp.maximum(h, 0.0)

    h = jnp.dot(h.astype(wdt), w3_ref[...],
                preferred_element_type=jnp.float32) + b3_ref[...]
    h = jnp.maximum(h, 0.0)

    logits = jnp.dot(h.astype(wdt), w4_ref[...],
                     preferred_element_type=jnp.float32) + b4_ref[...]

    # F.normalize(p=2, dim=1, eps=1e-12): x / max(||x||, eps)
    #   == x * rsqrt(max(sum(x^2), eps^2))
    # rsqrt is a single EUP op; the scale is a cheap VPU multiply, avoiding a
    # dependent sqrt -> divide chain.
    sumsq = jnp.sum(logits * logits, axis=-1, keepdims=True)
    inv = jax.lax.rsqrt(jnp.maximum(sumsq, 1e-24))
    o_ref[...] = (logits * inv).astype(o_ref.dtype)


def _round_up(n, m):
    return ((n + m - 1) // m) * m


def neural_network_forward(x, params, *, batch_tile=2048,
                           out_dtype=jnp.float32, use_bf16_matmul=False):
    """x: (B, ...) flattened to (B, 12); returns (B, 282) in `out_dtype`.

    use_bf16_matmul=True / out_dtype=jnp.bfloat16 are perf modes (looser
    numerical parity with PyTorch)."""
    B = x.shape[0]
    x2d = x.reshape(B, -1)                      # nn.Flatten (wrapper glue)
    if x2d.dtype != jnp.float32:
        x2d = x2d.astype(jnp.float32)
    assert x2d.shape[1] == IN_FEATURES, "model expects 12 features after flatten"

    (w1, b1), (w2, b2), (w3, b3), (w4, b4) = params
    out_dim = w4.shape[1]

    w_dtype = jnp.bfloat16 if use_bf16_matmul else jnp.float32
    ws = tuple(w.astype(w_dtype) for w in (w1, w2, w3, w4))
    bs = (b1, b2, b3, b4)                       # biases stay f32 (added to f32 acc)

    # ---- Batch tile selection ------------------------------------------------
    # Multiple of 8 (sublane), no larger than the (rounded-up) batch.
    tb = max(8, _round_up(min(batch_tile, _round_up(B, 8)), 8))
    steps = pl.cdiv(B, tb)
    # v7x megacore: an even number of grid steps lets the "parallel" batch axis
    # split evenly across the two TensorCores (harmless on single-TC v5e/v6e).
    if steps > 1 and steps % 2 == 1:
        steps += 1
        tb = max(8, _round_up(pl.cdiv(B, steps), 8))
        steps = pl.cdiv(B, tb)
    grid = (steps,)

    # ---- VMEM budget (padded-lane footprint, with margin) --------------------
    itemsize_out = np.dtype(out_dtype).itemsize
    lanes_in = _round_up(IN_FEATURES, 128)      # 12  -> 128
    lanes_out = _round_up(out_dim, 128)         # 282 -> 384
    lanes_mid = 128 + 128 + 128                 # 48, 48, 96 each pad to 128
    est = (2 * tb * (lanes_in * 4 + lanes_out * itemsize_out)   # dbl-buffered I/O
           + tb * (lanes_mid + lanes_out) * 4                    # f32 intermediates
           + (2 << 20))                                          # weights + slack
    vmem_bytes = max(min(int(est * 3 // 2), 64 << 20), 16 << 20)

    # ---- Cost hint for XLA's scheduler ---------------------------------------
    weight_bytes = sum(int(np.prod(w.shape)) for w in ws) * np.dtype(w_dtype).itemsize
    cost = pl.CostEstimate(
        flops=FLOPS_PER_ROW * B,
        transcendentals=B,                                    # one rsqrt per row
        bytes_accessed=B * (IN_FEATURES * 4 + out_dim * itemsize_out) + weight_bytes,
    )

    # Weights/biases: full-array blocks with a constant index_map => resident
    # in VMEM across every grid step (no re-DMA).  (~140 KB total.)
    def const_spec(a):
        return pl.BlockSpec(a.shape, lambda i: (0,) * a.ndim)

    out = pl.pallas_call(
        mlp_kernel,
        out_shape=jax.ShapeDtypeStruct((B, out_dim), out_dtype),
        grid=grid,
        in_specs=[
            pl.BlockSpec((tb, IN_FEATURES), lambda i: (i, 0)),   # streamed x
            const_spec(ws[0]), const_spec(bs[0]),
            const_spec(ws[1]), const_spec(bs[1]),
            const_spec(ws[2]), const_spec(bs[2]),
            const_spec(ws[3]), const_spec(bs[3]),
        ],
        out_specs=pl.BlockSpec((tb, out_dim), lambda i: (i, 0)),  # streamed out
        compiler_params=pltpu.CompilerParams(
            # Independent batch tiles: shard across v7x's two TensorCores;
            # harmless on single-TC v5e/v6e.
            dimension_semantics=("parallel",),
            vmem_limit_bytes=vmem_bytes,
        ),
        cost_estimate=cost,
    )(x2d, ws[0], bs[0], ws[1], bs[1], ws[2], bs[2], ws[3], bs[3])

    return out


def init_params(key):
    """Deterministic init matching PyTorch nn.Linear defaults:
    W, b ~ U(-1/sqrt(fan_in), 1/sqrt(fan_in)).
    Weights stored as (in, out); biases as (1, out) for 2-D TPU broadcasting."""
    dims = [(12, 48), (48, 48), (48, 96), (96, 282)]
    params = []
    for (fan_in, fan_out) in dims:
        key, kw, kb = jax.random.split(key, 3)
        bound = 1.0 / jnp.sqrt(float(fan_in))
        w = jax.random.uniform(kw, (fan_in, fan_out), jnp.float32, -bound, bound)
        b = jax.random.uniform(kb, (1, fan_out), jnp.float32, -bound, bound)
        params.append((w, b))
    return params


def _reference_forward(x, params):
    """Plain-JAX reference for the correctness check."""
    h = x.reshape(x.shape[0], -1).astype(jnp.float32)
    (w1, b1), (w2, b2), (w3, b3), (w4, b4) = params
    h = jnp.maximum(h @ w1 + b1, 0.0)
    h = jnp.maximum(h @ w2 + b2, 0.0)
    h = jnp.maximum(h @ w3 + b3, 0.0)
    logits = h @ w4 + b4
    norm = jnp.sqrt(jnp.sum(logits * logits, axis=-1, keepdims=True))
    return logits / jnp.maximum(norm, 1e-12)


if __name__ == "__main__":
    key = jax.random.PRNGKey(0)
    key, kx = jax.random.split(key)

    params = init_params(key)

    # Input that nn.Flatten reduces to 12 features: (batch=8, 2, 6).
    x = jax.random.normal(kx, (8, 2, 6), dtype=jnp.float32)

    out = jax.block_until_ready(neural_network_forward(x, params))
    assert out.shape == (8, OUT_FEATURES), out.shape
    ref = _reference_forward(x, params)
    assert jnp.allclose(out, ref, atol=1e-5, rtol=1e-5)

    # Exercise the unpadded partial-last-block path (B not a multiple of the
    # tile) and the even-step adjustment for v7x.
    key, kx2 = jax.random.split(key)
    x_big = jax.random.normal(kx2, (2500, 2, 6), dtype=jnp.float32)
    out_big = jax.block_until_ready(
        neural_network_forward(x_big, params, batch_tile=1024))
    assert out_big.shape == (2500, OUT_FEATURES), out_big.shape
    ref_big = _reference_forward(x_big, params)
    assert jnp.allclose(out_big, ref_big, atol=1e-5, rtol=1e-5)

    # Perf mode: bf16 matmul operands + bf16 output (looser parity by design).
    out_fast = jax.block_until_ready(
        neural_network_forward(x_big, params, batch_tile=1024,
                               use_bf16_matmul=True, out_dtype=jnp.bfloat16))
    assert out_fast.shape == (2500, OUT_FEATURES), out_fast.shape
    out_fast_f32 = out_fast.astype(jnp.float32)
    assert bool(jnp.all(jnp.isfinite(out_fast_f32)))
    assert jnp.allclose(out_fast_f32, ref_big, atol=0.06)

    print("KERNEL_OK")
</pallas_src>

<mosaic_0001>
module attributes {stable_mosaic.version = 11 : i64} {
  func.func @mlp_kernel(%arg0: i32, %arg1: memref<8x12xf32, #tpu.memory_space<vmem>>, %arg2: memref<12x48xf32, #tpu.memory_space<vmem>>, %arg3: memref<1x48xf32, #tpu.memory_space<vmem>>, %arg4: memref<48x48xf32, #tpu.memory_space<vmem>>, %arg5: memref<1x48xf32, #tpu.memory_space<vmem>>, %arg6: memref<48x96xf32, #tpu.memory_space<vmem>>, %arg7: memref<1x96xf32, #tpu.memory_space<vmem>>, %arg8: memref<96x282xf32, #tpu.memory_space<vmem>>, %arg9: memref<1x282xf32, #tpu.memory_space<vmem>>, %arg10: memref<8x282xf32, #tpu.memory_space<vmem>>) attributes {dimension_semantics = [#tpu.dimension_semantics<parallel>], iteration_bounds = array<i64: 1>, scalar_prefetch = 0 : i64, scratch_operands = 0 : i64, tpu.core_type = #tpu.core_type<tc>, window_params = [{transform_indices = @transform_0, window_bounds = array<i64: 8, 12>}, {pipeline_mode = #tpu.pipeline_mode<synchronous>, transform_indices = @transform_1, window_bounds = array<i64: 12, 48>}, {pipeline_mode = #tpu.pipeline_mode<synchronous>, transform_indices = @transform_2, window_bounds = array<i64: 1, 48>}, {pipeline_mode = #tpu.pipeline_mode<synchronous>, transform_indices = @transform_3, window_bounds = array<i64: 48, 48>}, {pipeline_mode = #tpu.pipeline_mode<synchronous>, transform_indices = @transform_4, window_bounds = array<i64: 1, 48>}, {pipeline_mode = #tpu.pipeline_mode<synchronous>, transform_indices = @transform_5, window_bounds = array<i64: 48, 96>}, {pipeline_mode = #tpu.pipeline_mode<synchronous>, transform_indices = @transform_6, window_bounds = array<i64: 1, 96>}, {pipeline_mode = #tpu.pipeline_mode<synchronous>, transform_indices = @transform_7, window_bounds = array<i64: 96, 282>}, {pipeline_mode = #tpu.pipeline_mode<synchronous>, transform_indices = @transform_8, window_bounds = array<i64: 1, 282>}, {transform_indices = @transform_9, window_bounds = array<i64: 8, 282>}]} {
    %c0 = arith.constant 0 : index
    %c0_0 = arith.constant 0 : index
    %0 = vector.load %arg1[%c0, %c0_0] : memref<8x12xf32, #tpu.memory_space<vmem>>, vector<8x12xf32>
    %c0_1 = arith.constant 0 : index
    %c0_2 = arith.constant 0 : index
    %1 = vector.load %arg2[%c0_1, %c0_2] : memref<12x48xf32, #tpu.memory_space<vmem>>, vector<12x48xf32>
    %cst = arith.constant dense<0.000000e+00> : vector<8x48xf32>
    %2 = tpu.matmul %0, %1, %cst {dimension_numbers = #tpu.dot_dimension_numbers<[1], [0], [0], [1], [0, 0, 1, 1], [], []>} : vector<8x12xf32>, vector<12x48xf32>, vector<8x48xf32> -> vector<8x48xf32>
    %c0_3 = arith.constant 0 : index
    %c0_4 = arith.constant 0 : index
    %3 = vector.load %arg3[%c0_3, %c0_4] : memref<1x48xf32, #tpu.memory_space<vmem>>, vector<1x48xf32>
    %4 = vector.broadcast %3 : vector<1x48xf32> to vector<8x48xf32>
    %5 = arith.addf %2, %4 : vector<8x48xf32>
    %cst_5 = arith.constant 0.000000e+00 : f32
    %6 = vector.broadcast %cst_5 : f32 to vector<8x48xf32>
    %7 = arith.maximumf %5, %6 : vector<8x48xf32>
    %c0_6 = arith.constant 0 : index
    %c0_7 = arith.constant 0 : index
    %8 = vector.load %arg4[%c0_6, %c0_7] : memref<48x48xf32, #tpu.memory_space<vmem>>, vector<48x48xf32>
    %cst_8 = arith.constant dense<0.000000e+00> : vector<8x48xf32>
    %9 = tpu.matmul %7, %8, %cst_8 {dimension_numbers = #tpu.dot_dimension_numbers<[1], [0], [0], [1], [0, 0, 1, 1], [], []>} : vector<8x48xf32>, vector<48x48xf32>, vector<8x48xf32> -> vector<8x48xf32>
    %c0_9 = arith.constant 0 : index
    %c0_10 = arith.constant 0 : index
    %10 = vector.load %arg5[%c0_9, %c0_10] : memref<1x48xf32, #tpu.memory_space<vmem>>, vector<1x48xf32>
    %11 = vector.broadcast %10 : vector<1x48xf32> to vector<8x48xf32>
    %12 = arith.addf %9, %11 : vector<8x48xf32>
    %cst_11 = arith.constant 0.000000e+00 : f32
    %13 = vector.broadcast %cst_11 : f32 to vector<8x48xf32>
    %14 = arith.maximumf %12, %13 : vector<8x48xf32>
    %c0_12 = arith.constant 0 : index
    %c0_13 = arith.constant 0 : index
    %15 = vector.load %arg6[%c0_12, %c0_13] : memref<48x96xf32, #tpu.memory_space<vmem>>, vector<48x96xf32>
    %cst_14 = arith.constant dense<0.000000e+00> : vector<8x96xf32>
    %16 = tpu.matmul %14, %15, %cst_14 {dimension_numbers = #tpu.dot_dimension_numbers<[1], [0], [0], [1], [0, 0, 1, 1], [], []>} : vector<8x48xf32>, vector<48x96xf32>, vector<8x96xf32> -> vector<8x96xf32>
    %c0_15 = arith.constant 0 : index
    %c0_16 = arith.constant 0 : index
    %17 = vector.load %arg7[%c0_15, %c0_16] : memref<1x96xf32, #tpu.memory_space<vmem>>, vector<1x96xf32>
    %18 = vector.broadcast %17 : vector<1x96xf32> to vector<8x96xf32>
    %19 = arith.addf %16, %18 : vector<8x96xf32>
    %cst_17 = arith.constant 0.000000e+00 : f32
    %20 = vector.broadcast %cst_17 : f32 to vector<8x96xf32>
    %21 = arith.maximumf %19, %20 : vector<8x96xf32>
    %c0_18 = arith.constant 0 : index
    %c0_19 = arith.constant 0 : index
    %22 = vector.load %arg8[%c0_18, %c0_19] : memref<96x282xf32, #tpu.memory_space<vmem>>, vector<96x282xf32>
    %cst_20 = arith.constant dense<0.000000e+00> : vector<8x282xf32>
    %23 = tpu.matmul %21, %22, %cst_20 {dimension_numbers = #tpu.dot_dimension_numbers<[1], [0], [0], [1], [0, 0, 1, 1], [], []>} : vector<8x96xf32>, vector<96x282xf32>, vector<8x282xf32> -> vector<8x282xf32>
    %c0_21 = arith.constant 0 : index
    %c0_22 = arith.constant 0 : index
    %24 = vector.load %arg9[%c0_21, %c0_22] : memref<1x282xf32, #tpu.memory_space<vmem>>, vector<1x282xf32>
    %25 = vector.broadcast %24 : vector<1x282xf32> to vector<8x282xf32>
    %26 = arith.addf %23, %25 : vector<8x282xf32>
    %27 = arith.mulf %26, %26 : vector<8x282xf32>
    %cst_23 = arith.constant dense<0.000000e+00> : vector<8xf32>
    %28 = vector.multi_reduction <add>, %27, %cst_23 [1] : vector<8x282xf32> to vector<8xf32>
    %29 = vector.shape_cast %28 : vector<8xf32> to vector<8x1xf32>
    %cst_24 = arith.constant 1.000000e-24 : f32
    %30 = vector.broadcast %cst_24 : f32 to vector<8x1xf32>
    %31 = arith.maximumf %29, %30 : vector<8x1xf32>
    %32 = math.rsqrt %31 : vector<8x1xf32>
    %33 = vector.broadcast %32 : vector<8x1xf32> to vector<8x282xf32>
    %34 = arith.mulf %26, %33 : vector<8x282xf32>
    %c0_25 = arith.constant 0 : index
    %c0_26 = arith.constant 0 : index
    %35 = vector.load %arg10[%c0_25, %c0_26] : memref<8x282xf32, #tpu.memory_space<vmem>>, vector<8x282xf32>
    tpu.vector_store %arg10[%c0_25, %c0_26], %34 {strides = array<i32>} : memref<8x282xf32, #tpu.memory_space<vmem>>, vector<8x282xf32>,
    return
  }
  func.func @transform_0(%arg0: i32) -> (i32, i32) {
    %c0_i32 = arith.constant 0 : i32
    %c0_i32_0 = arith.constant 0 : i32
    return %arg0, %c0_i32 : i32, i32
  }
  func.func @transform_1(%arg0: i32) -> (i32, i32) {
    %c0_i32 = arith.constant 0 : i32
    %c0_i32_0 = arith.constant 0 : i32
    %c0_i32_1 = arith.constant 0 : i32
    return %c0_i32, %c0_i32_0 : i32, i32
  }
  func.func @transform_2(%arg0: i32) -> (i32, i32) {
    %c0_i32 = arith.constant 0 : i32
    %c0_i32_0 = arith.constant 0 : i32
    %c0_i32_1 = arith.constant 0 : i32
    return %c0_i32, %c0_i32_0 : i32, i32
  }
  func.func @transform_3(%arg0: i32) -> (i32, i32) {
    %c0_i32 = arith.constant 0 : i32
    %c0_i32_0 = arith.constant 0 : i32
    %c0_i32_1 = arith.constant 0 : i32
    return %c0_i32, %c0_i32_0 : i32, i32
  }
  func.func @transform_4(%arg0: i32) -> (i32, i32) {
    %c0_i32 = arith.constant 0 : i32
    %c0_i32_0 = arith.constant 0 : i32
    %c0_i32_1 = arith.constant 0 : i32
    return %c0_i32, %c0_i32_0 : i32, i32
  }
  func.func @transform_5(%arg0: i32) -> (i32, i32) {
    %c0_i32 = arith.constant 0 : i32
    %c0_i32_0 = arith.constant 0 : i32
    %c0_i32_1 = arith.constant 0 : i32
    return %c0_i32, %c0_i32_0 : i32, i32
  }
  func.func @transform_6(%arg0: i32) -> (i32, i32) {
    %c0_i32 = arith.constant 0 : i32
    %c0_i32_0 = arith.constant 0 : i32
    %c0_i32_1 = arith.constant 0 : i32
    return %c0_i32, %c0_i32_0 : i32, i32
  }
  func.func @transform_7(%arg0: i32) -> (i32, i32) {
    %c0_i32 = arith.constant 0 : i32
    %c0_i32_0 = arith.constant 0 : i32
    %c0_i32_1 = arith.constant 0 : i32
    return %c0_i32, %c0_i32_0 : i32, i32
  }
  func.func @transform_8(%arg0: i32) -> (i32, i32) {
    %c0_i32 = arith.constant 0 : i32
    %c0_i32_0 = arith.constant 0 : i32
    %c0_i32_1 = arith.constant 0 : i32
    return %c0_i32, %c0_i32_0 : i32, i32
  }
  func.func @transform_9(%arg0: i32) -> (i32, i32) {
    %c0_i32 = arith.constant 0 : i32
    %c0_i32_0 = arith.constant 0 : i32
    return %arg0, %c0_i32 : i32, i32
  }
}

</mosaic_0001>

<bundles_post_ra>
// kernel: tpu_custom_call.1
= control target key start
LH: loop header
LB: loop body
LE: loop exit
PB: predicated region body
PF: predicated region fallthrough
CT: control target
= control target key end

     0   :  { %14 = vsyncpa [#allocation3], 0  ;;  %s678_s0 = inlined_call_operand.hbm [shape: f32[8,12], index: 0, kind: input, shape index: {}]   ;;  %s679_s1 = inlined_call_operand.hbm [shape: f32[12,48], index: 1, kind: input, shape index: {}]   ;;  %s680_s2 = inlined_call_operand.vmem [shape: f32[1,48], index: 2, kind: input, shape index: {}]   ;;  %s681_s3 = inlined_call_operand.hbm [shape: f32[48,48], index: 3, kind: input, shape index: {}]   ;;  %s682_s4 = inlined_call_operand.vmem [shape: f32[1,48], index: 4, kind: input, shape index: {}]   ;;  %s683_s5 = inlined_call_operand.hbm [shape: f32[48,96], index: 5, kind: input, shape index: {}]   ;;  %s684_s6 = inlined_call_operand.hbm [shape: f32[1,96], index: 6, kind: input, shape index: {}]   ;;  %s685_s7 = inlined_call_operand.hbm [shape: f32[96,282], index: 7, kind: input, shape index: {}]   ;;  %s686_s8 = inlined_call_operand.vmem [shape: f32[1,282], index: 8, kind: input, shape index: {}]   ;;  %s687_s9 = inlined_call_operand.hbm [shape: f32[8,282], index: 9, kind: output, shape index: {}]  }
   0x1   :  { %15 = vsyncpa [#allocation6], 0 }
   0x2   :  { %16 = vsyncpa [#allocation9], 0 }
   0x3   :  { %17 = vsyncpa [#allocation12], 0  ;;  %s34_s11 = sshll.u32 %s679_s1, 4  ;;  %s35_s11 = int_to_ptr.hbm [resolvable:$true] %s34_s11 }
   0x4   :  { %18 = vsyncpa [#allocation4], 0  ;;  %s583_s12 = smov [#allocation5]   ;;  %s64_s16 = sshll.u32 %s683_s5, 4  ;;  %s65_s16 = int_to_ptr.hbm [resolvable:$true] %s64_s16 }
   0x5   :  { %s36_s13 = sshll.u32 %s583_s12, 4  ;;  %s584_s17 = smov 128   ;;  %s37_s13 = int_to_ptr.vmem [resolvable:$true] %s36_s13 }
   0x6   :  { %s585_s18 = smov 8   ;;  %s586_s19 = smov [#allocation8]  }
   0x7   :  { %42 = dma.hbm_to_vmem [thread:$0]  %s35_s11, 256, %s37_s13, [#allocation6], %s584_s17, %s584_s17, %s585_s18  }
   0x8   :  { %s66_s20 = sshll.u32 %s586_s19, 4  ;;  %s24_s23 = sshll.u32 %s678_s0, 4  ;;  %s67_s20 = int_to_ptr.vmem [resolvable:$true] %s66_s20  ;;  %s25_s23 = int_to_ptr.hbm [resolvable:$true] %s24_s23 }
   0x9   :  { %72 = dma.hbm_to_vmem [thread:$0]  %s65_s16, 768, %s67_s20, [#allocation9], %s584_s17, %s584_s17, %s585_s18  }
   0xa   :  { %s49_s25 = sshll.u32 %s681_s3, 4  ;;  %s587_s26 = smov [#allocation2]   ;;  %s50_s25 = int_to_ptr.hbm [resolvable:$true] %s49_s25 }
   0xb   :  { %s26_s27 = sshll.u32 %s587_s26, 4  ;;  %s588_s5 = smov [#allocation7]   ;;  %s27_s27 = int_to_ptr.vmem [resolvable:$true] %s26_s27 }
   0xc   :  { %29 = dma.hbm_to_vmem [thread:$0]  %s25_s23, 128, %s27_s27, [#allocation3]  }
   0xd   :  { %s51_s28 = sshll.u32 %s588_s5, 4  ;;  %s78_s10 = sshll.u32 %s684_s6, 4  ;;  %s52_s28 = int_to_ptr.vmem [resolvable:$true] %s51_s28  ;;  %s79_s10 = int_to_ptr.hbm [resolvable:$true] %s78_s10 }
   0xe   :  { %57 = dma.hbm_to_vmem [thread:$0]  %s50_s25, 768, %s52_s28, [#allocation6], %s584_s17, %s584_s17, %s585_s18  }
   0xf   :  { %s88_s12 = sshll.u32 %s685_s7, 4  ;;  %s589_s13 = smov [#allocation10]   ;;  %s89_s12 = int_to_ptr.hbm [resolvable:$true] %s88_s12 }
  0x10   :  { %s80_s3 = sshll.u32 %s589_s13, 4  ;;  %s590_s14 = smov [#allocation11]   ;;  %s81_s3 = int_to_ptr.vmem [resolvable:$true] %s80_s3 }
  0x11   :  { %83 = dma.hbm_to_vmem [thread:$0]  %s79_s10, 16, %s81_s3, [#allocation9]  }
  0x12   :  { %s90_s15 = sshll.u32 %s590_s14, 4  ;;  %s591_s16 = smov 384   ;;  %s91_s15 = int_to_ptr.vmem [resolvable:$true] %s90_s15 }
  0x13   :  { %s592_s19 = smov 24  }
  0x14   :  { %96 = dma.hbm_to_vmem [thread:$0]  %s89_s12, 4608, %s91_s15, [#allocation12], %s591_s16, %s591_s16, %s592_s19  }
  0x15   :  { %573 = dma.done.wait [#allocation3], 128  }
  0x16   :  { %574 = vsyncadd [#allocation3], 4294967168 }
  0x17   :  { %575 = dma.done.wait [#allocation6], 1024  }
  0x18   :  { %576 = vsyncadd [#allocation6], 4294966272 }
  0x19   :  { %577 = dma.done.wait [#allocation9], 784  }
  0x1a   :  { %578 = vsyncadd [#allocation9], 4294966512 }
  0x1b   :  { %579 = dma.done.wait [#allocation12], 4608  }
  0x1c   :  { %580 = vsyncadd [#allocation12], 4294962688  ;;  %vm134_vm0 = vcmask 1043456   ;;  %v125_v0 = vld [vmem:[#allocation5 + $0x8] sm:$0xf]  ;;  %v124_v1 = vld [vmem:[#allocation5] sm:$0xff] }
  0x1d   :  { %382 = vmatpush.msk.msra.mxu0 %vm134_vm0, %v125_v0  ;;  %v123_v2 = vld [vmem:[#allocation2] sm:$0xff]  ;;  %vm130_vm1 = vcmask 97280   ;;  %v163_v4 = vld [vmem:[#allocation7 + $0x20] sm:$0xff]  ;;  %v162_v5 = vld [vmem:[#allocation7 + $0x18] sm:$0xff]  ;;  %vm169_vm2 = vcmask 392192   ;;  %vm272_vm3 = vcmask 785408  }
  0x1e   :  { %v164_v3 = vld [vmem:[#allocation7 + $0x28] sm:$0xff]  ;;  %v161_v6 = vld [vmem:[#allocation7 + $0x10] sm:$0xff]  ;;  %v159_v8 = vld [vmem:[#allocation7] sm:$0xff]  ;;  %vm340_vm4 = vcmask 211968   ;;  %s369_s23 = sshll.u32 %s687_s9, 4  ;;  %s370_s23 = int_to_ptr.hbm [resolvable:$true] %s369_s23 }
  0x1f   :  { %183 = vmatpush.msra.mxu2 %v164_v3  ;;  %153 = vmatpush.msra.mxu0 %v124_v1  ;;  %v160_v7 = vld [vmem:[#allocation7 + $0x8] sm:$0xff]  ;;  %v199_v9 = vld [vmem:[#allocation8 + $0x28] sm:$0xff]  ;;  %v198_v10 = vld [vmem:[#allocation8 + $0x20] sm:$0xff] }
  0x20   :  { %383 = vmatmul.msk.f32.vlgmr.msra.gmra.mxu0 %vm130_vm1, %v123_v2  ;;  %v197_v11 = vld [vmem:[#allocation8 + $0x18] sm:$0xff]  ;;  %v196_v16 = vld [vmem:[#allocation8 + $0x10] sm:$0xff]  ;;  %v195_v17 = vld [vmem:[#allocation8 + $0x8] sm:$0xff] }
  0x21   :  { %184 = vmatpush.msra.mxu2 %v163_v4  ;;  %v400_v12 = vld [vmem:[%s680_s2] ss:$0 sm:$0xff]  ;;  %v194_v18 = vld [vmem:[#allocation8] sm:$0xff]  ;;  %v263_v21 = vld [vmem:[#allocation11 + $0x118] sm:$0xff] }
  0x22   :  { %v261_v19 = vld [vmem:[#allocation11 + $0x108] sm:$0xff]  ;;  %v262_v20 = vld [vmem:[#allocation11 + $0x110] sm:$0xff]  ;;  %v259_v23 = vld [vmem:[#allocation11 + $0xf8] sm:$0xff]  ;;  %320 = vmatpush.msra.mxu1 %v263_v21 }
  0x23   :  { %185 = vmatpush.msra.mxu2 %v162_v5  ;;  %280 = vmatpush.msra.mxu3 %v261_v19  ;;  %v258_v22 = vld [vmem:[#allocation11 + $0xf0] sm:$0xff]  ;;  %v260_v24 = vld [vmem:[#allocation11 + $0x100] sm:$0xff]  ;;  %v255_v25 = vld [vmem:[#allocation11 + $0xd8] sm:$0xff] }
  0x24   :  { %300 = vmatpush.msrb.mxu0 %v262_v20  ;;  %v256_v26 = vld [vmem:[#allocation11 + $0xe0] sm:$0xff]  ;;  %v257_v27 = vld [vmem:[#allocation11 + $0xe8] sm:$0xff]  ;;  %321 = vmatpush.msra.mxu1 %v260_v24  ;;  %v254_v30 = vld [vmem:[#allocation11 + $0xd0] sm:$0xff] }
  0x25   :  { %186 = vmatpush.msra.mxu2 %v161_v6  ;;  %281 = vmatpush.msra.mxu3 %v258_v22  ;;  %v252_v28 = vld [vmem:[#allocation11 + $0xc0] sm:$0xff]  ;;  %v253_v29 = vld [vmem:[#allocation11 + $0xc8] sm:$0xff]  ;;  %v250_v32 = vld [vmem:[#allocation11 + $0xb0] sm:$0xff] }
  0x26   :  { %301 = vmatpush.msrb.mxu0 %v259_v23  ;;  %322 = vmatpush.msra.mxu1 %v257_v27  ;;  %v249_v31 = vld [vmem:[#allocation11 + $0xa8] sm:$0xff]  ;;  %v251_v33 = vld [vmem:[#allocation11 + $0xb8] sm:$0xff]  ;;  %v246_v34 = vld [vmem:[#allocation11 + $0x90] sm:$0xff] }
  0x27   :  { %187 = vmatpush.msra.mxu2 %v160_v7  ;;  %282 = vmatpush.msra.mxu3 %v255_v25  ;;  %v247_v35 = vld [vmem:[#allocation11 + $0x98] sm:$0xff]  ;;  %v248_v36 = vld [vmem:[#allocation11 + $0xa0] sm:$0xff]  ;;  %v245_v39 = vld [vmem:[#allocation11 + $0x88] sm:$0xff] }
  0x28   :  { %302 = vmatpush.msrb.mxu0 %v256_v26  ;;  %323 = vmatpush.msra.mxu1 %v254_v30  ;;  %v243_v37 = vld [vmem:[#allocation11 + $0x78] sm:$0xff]  ;;  %v244_v38 = vld [vmem:[#allocation11 + $0x80] sm:$0xff]  ;;  %v241_v41 = vld [vmem:[#allocation11 + $0x68] sm:$0xff] }
  0x29   :  { %188 = vmatpush.msra.mxu2 %v159_v8  ;;  %283 = vmatpush.msra.mxu3 %v252_v28  ;;  %v240_v40 = vld [vmem:[#allocation11 + $0x60] sm:$0xff]  ;;  %v242_v42 = vld [vmem:[#allocation11 + $0x70] sm:$0xff]  ;;  %v237_v43 = vld [vmem:[#allocation11 + $0x48] sm:$0xff] }
  0x2a   :  { %303 = vmatpush.msrb.mxu0 %v253_v29  ;;  %324 = vmatpush.msra.mxu1 %v251_v33  ;;  %v238_v44 = vld [vmem:[#allocation11 + $0x50] sm:$0xff]  ;;  %v239_v45 = vld [vmem:[#allocation11 + $0x58] sm:$0xff]  ;;  %v401_v46 = vld [vmem:[%s682_s4] ss:$0 sm:$0xff] }
  0x2b   :  { %217 = vmatpush.msrb.mxu2 %v199_v9  ;;  %284 = vmatpush.msra.mxu3 %v249_v31  ;;  %v234_v50 = vld [vmem:[#allocation11 + $0x30] sm:$0xff]  ;;  %v235_v51 = vld [vmem:[#allocation11 + $0x38] sm:$0xff]  ;;  %v236_v52 = vld [vmem:[#allocation11 + $0x40] sm:$0xff] }
  0x2c   :  { %304 = vmatpush.msrb.mxu0 %v250_v32  ;;  %325 = vmatpush.msra.mxu1 %v248_v36  ;;  %v231_v53 = vld [vmem:[#allocation11 + $0x18] sm:$0xff]  ;;  %v232_v54 = vld [vmem:[#allocation11 + $0x20] sm:$0xff]  ;;  %v233_v55 = vld [vmem:[#allocation11 + $0x28] sm:$0xff] }
  0x2d   :  { %218 = vmatpush.msrb.mxu2 %v198_v10  ;;  %285 = vmatpush.msra.mxu3 %v246_v34  ;;  %v228_v56 = vld [vmem:[#allocation11] sm:$0xff]  ;;  %v229_v57 = vld [vmem:[#allocation11 + $0x8] sm:$0xff]  ;;  %v230_v58 = vld [vmem:[#allocation11 + $0x10] sm:$0xff] }
  0x2e   :  { %305 = vmatpush.msrb.mxu0 %v247_v35  ;;  %326 = vmatpush.msra.mxu1 %v245_v39  ;;  %v402_v59 = vld [vmem:[#allocation10] ss:$0 sm:$0xff]  ;;  %v264_v63 = vld [vmem:[%s686_s8] sm:$0x7]  ;;  %s593_s8 = smov [#allocation13]  }
  0x2f   :  { %219 = vmatpush.msrb.mxu2 %v197_v11  ;;  %286 = vmatpush.msra.mxu3 %v243_v37  ;;  %v268_v0 = vperm.slane %v264_v63, 2  ;;  %v267_v1 = vperm.slane %v264_v63, 1  ;;  %v266_v4 = vperm.slane %v264_v63, 0  ;;  %s367_s20 = sshll.u32 %s593_s8, 4  ;;  %s368_s20 = int_to_ptr.vmem [resolvable:$true] %s367_s20 }
  0x30   :  { %306 = vmatpush.msrb.mxu0 %v244_v38  ;;  %327 = vmatpush.msra.mxu1 %v242_v42 }
  0x31   :  { %220 = vmatpush.msrb.mxu2 %v196_v16  ;;  %287 = vmatpush.msra.mxu3 %v240_v40 }
  0x32   :  { %307 = vmatpush.msrb.mxu0 %v241_v41  ;;  %328 = vmatpush.msra.mxu1 %v239_v45 }
  0x33   :  { %221 = vmatpush.msrb.mxu2 %v195_v17  ;;  %288 = vmatpush.msra.mxu3 %v237_v43 }
  0x34   :  { %308 = vmatpush.msrb.mxu0 %v238_v44  ;;  %329 = vmatpush.msra.mxu1 %v236_v52 }
  0x35   :  { %222 = vmatpush.msrb.mxu2 %v194_v18  ;;  %289 = vmatpush.msra.mxu3 %v234_v50 }
  0x36   :  { %309 = vmatpush.msrb.mxu0 %v235_v51  ;;  %330 = vmatpush.msra.mxu1 %v233_v55 }
  0x37   :  { %290 = vmatpush.msra.mxu3 %v231_v53 }
  0x38   :  { %310 = vmatpush.msrb.mxu0 %v232_v54  ;;  %331 = vmatpush.msra.mxu1 %v230_v58 }
  0x39   :  { %291 = vmatpush.msra.mxu3 %v228_v56 }
  0x3a   :  { %311 = vmatpush.msrb.mxu0 %v229_v57 }
  0x9d   :  { %v155_v13 = vpop.f32.mrf.mxu0 }
  0x9e   :  { %v156_v14 = vadd.f32 %v400_v12, %v155_v13 }
  0xa0   :  { %v158_v15 = vmax.f32 %v156_v14, 0.0 }
  0xa2   :  { %384 = vmatmul.msk.f32.vlgmr.msra.gmra.mxu2 %vm169_vm2, %v158_v15 }
 0x125   :  { %v190_v47 = vpop.f32.mrf.mxu2 }
 0x126   :  { %v191_v48 = vadd.f32 %v401_v46, %v190_v47 }
 0x128   :  { %v193_v49 = vmax.f32 %v191_v48, 0.0 }
 0x12a   :  { %385 = vmatmul.msk.f32.vlgmr.msrb.gmra.mxu2 %vm169_vm2, %v193_v49 }
 0x1ad   :  { %v224_v60 = vpop.f32.mrf.mxu2 }
 0x1ae   :  { %v225_v61 = vadd.f32 %v402_v59, %v224_v60 }
 0x1b0   :  { %v227_v62 = vmax.f32 %v225_v61, 0.0 }
 0x1b2   :  { %386 = vmatmul.msk.f32.vlgmr.msra.gmra.mxu3 %vm272_vm3, %v227_v62  ;;  %387 = vmatmul.msk.f32.vlgmr.msrb.gmra.mxu0 %vm272_vm3, %v227_v62 }
 0x1b3   :  { %388 = vmatmul.msk.f32.vlgmr.msra.gmra.mxu1 %vm272_vm3, %v227_v62 }
 0x22f   :  { %v313_v3 = vpop.f32.mrf.mxu0 }
 0x230   :  { %v333_v2 = vpop.f32.mrf.mxu1  ;;  %v314_v6 = vadd.f32 %v313_v3, %v267_v1 }
 0x231   :  { %v334_v5 = vadd.f32 %v333_v2, %v268_v0 }
 0x232   :  { %v337_v10 = vmul.f32 %v314_v6, %v314_v6 }
 0x233   :  { %v338_v9 = vmul.f32 %v334_v5, %v334_v5 }
 0x235   :  { %v293_v7 = vpop.f32.mrf.mxu3  ;;  %v341_v13 = vsel %vm340_vm4, %v338_v9, 0.0 }
 0x236   :  { %v294_v8 = vadd.f32 %v293_v7, %v266_v4 }
 0x238   :  { %v336_v11 = vmul.f32 %v294_v8, %v294_v8 }
 0x23a   :  { %v339_v12 = vadd.f32 %v337_v10, %v336_v11 }
 0x23c   :  { %v342_v14 = vadd.f32 %v341_v13, %v339_v12 }
 0x23e   :  { %343 = vadd.xlane.f32.xlu0 %v342_v14 }
 0x2b1   :  { %v344_v15 = vpop.xlane.xlu0 %343 }
 0x2b2   :  { %v345_v16 = vmax.f32 %v344_v15, 1e-24 }
 0x2b4   :  { %403 = vrsqrt.f32 %v345_v16  ;;  %vm352_vm6 = vweird.f32 %v345_v16 }
 0x2ba   :  { %v404_v17 = vpop.eup %403 }
 0x2bb   :  { %v347_v18 = vmul.f32 %v404_v17, %v345_v16  ;;  %vm353_vm5 = vweird.f32 %v404_v17 }
 0x2bc   :  { %vm354_vm7 = vmor %vm352_vm6, %vm353_vm5 }
 0x2bd   :  { %v348_v19 = vmul.f32 %v404_v17, %v347_v18 }
 0x2bf   :  { %v349_v20 = vmul.f32 0.5, %v348_v19 }
 0x2c1   :  { %v350_v21 = vsub.f32 1.5, %v349_v20 }
 0x2c3   :  { %v351_v22 = vmul.f32 %v404_v17, %v350_v21 }
 0x2c5   :  { %v355_v23 = vsel %vm354_vm7, %v404_v17, %v351_v22 }
 0x2c6   :  { %v356_v24 = vmul.f32 %v355_v23, %v294_v8  ;;  %v357_v25 = vmul.f32 %v355_v23, %v314_v6  ;;  %v358_v26 = vmul.f32 %v355_v23, %v334_v5 }
 0x2c8   :  { %359 = vst [vmem:[#allocation13] sm:$0xff] %v356_v24 }
 0x2c9   :  { %360 = vst [vmem:[#allocation13 + $0x8] sm:$0xff] %v357_v25 }
 0x2ca   :  { %361 = vst.msk [vmem:[#allocation13 + $0x10] sm:$0xff] %vm340_vm4, %v358_v26 }
 0x2cb   :  { %372 = dma.vmem_to_hbm [thread:$0]  %s368_s20, 384, %s370_s23, [#allocation4]  }
 0x2cc   :  { %581 = dma.done.wait [#allocation4], 384  }
 0x2cd   :  { %582 = vsyncadd [#allocation4], 4294966912 }
 0x2ce   :  { %377 = vsyncpa [#allocation3], 1 }
 0x2cf   :  { %378 = vsyncpa [#allocation6], 1 }
 0x2d0   :  { %379 = vsyncpa [#allocation9], 1 }
 0x2d1   :  { %380 = vsyncpa [#allocation12], 1 }
 0x2d2   :  { %381 = vsyncpa [#allocation4], 1 }

</bundles_post_ra>
